<compile_context>
chip_gen: v5e
topology: v5e:2x2
jax: 0.10.0
libtpu: 0.0.40
codegen_flags: <defaults>
</compile_context>

<pallas_src>
import functools

import jax
import jax.numpy as jnp
from jax.experimental import pallas as pl
from jax.experimental.pallas import tpu as pltpu


def _round_up(x, m):
    return (x + m - 1) // m * m


# ------------------------- Pallas kernel (hot path) -------------------------
def _moe_kernel(feat_ref, disp_ref, comb_ref, w1_ref, b1_ref, w2_ref, b2_ref,
                out_ref, acc_ref):
    """Grid = (num_token_tiles, num_experts); expert axis innermost.

    feat_ref : (tS, M)        bf16  token-tile features (shared across experts)
    disp_ref : (C, tS)        bf16  dispatch mask slice for expert e
    comb_ref : (tS, C)        bf16  combine weights slice for expert e
    w1_ref   : (M, mid_p)     bf16
    b1_ref   : (1, mid_p)     f32
    w2_ref   : (mid_p, out_p) bf16
    b2_ref   : (1, out_p)     f32
    out_ref  : (tS, out_p)          written on the last expert
    acc_ref  : (tS, out_p)    f32   accumulator resident across the expert axis
    """
    e = pl.program_id(1)

    @pl.when(e == 0)
    def _():
        acc_ref[...] = jnp.zeros_like(acc_ref)

    # dispatch:  (C,tS) @ (tS,M) -> (C,M); bf16 MXU inputs, f32 accumulation.
    x = jnp.dot(disp_ref[...], feat_ref[...], preferred_element_type=jnp.float32)
    # expert FFN: ReLU(x @ W1 + b1) @ W2 + b2
    # (x is a one-hot selection of bf16 features -> the bf16 recast is exact)
    h = jnp.maximum(
        jnp.dot(x.astype(w1_ref.dtype), w1_ref[...],
                preferred_element_type=jnp.float32) + b1_ref[...], 0.0)
    y = jnp.dot(h.astype(w2_ref.dtype), w2_ref[...],
                preferred_element_type=jnp.float32) + b2_ref[...]
    # combine:  (tS,C) @ (C,out_p), accumulated over experts in f32.
    acc_ref[...] += jnp.dot(comb_ref[...], y.astype(comb_ref.dtype),
                            preferred_element_type=jnp.float32)

    @pl.when(e == pl.num_programs(1) - 1)
    def _():
        out_ref[...] = acc_ref[...].astype(out_ref.dtype)


def _vmem_working_set_bytes(ts, M, C, mid_p, out_p):
    bf16, f32 = 2, 4
    dbuf_in = 2 * (ts * M * bf16 + C * ts * bf16 + ts * C * bf16
                   + M * mid_p * bf16 + mid_p * f32
                   + mid_p * out_p * bf16 + out_p * f32)
    dbuf_out = 2 * ts * out_p * f32
    scratch = ts * out_p * f32
    return dbuf_in + dbuf_out + scratch


def _choose_token_tile(S, M, C, mid_p, out_p, budget=40 << 20, max_ts=2048):
    # tS must be a multiple of 128: it is the lane dim of the dispatch slab.
    ts = min(max_ts, _round_up(S, 128))
    while ts > 128 and _vmem_working_set_bytes(ts, M, C, mid_p, out_p) > budget:
        ts -= 128
    return ts


def _moe_pallas(features, disp, comb, w1, b1, w2, b2, ts, out_dtype):
    S_pad, M = features.shape
    E, C, _ = disp.shape
    mid_p = w1.shape[-1]
    out_p = w2.shape[-1]
    n_s = S_pad // ts

    ws = _vmem_working_set_bytes(ts, M, C, mid_p, out_p)
    vmem_limit = int(min(max(int(1.3 * ws), 16 << 20), 64 << 20))

    flops = 2 * E * C * (S_pad * M + n_s * M * mid_p
                         + n_s * mid_p * out_p + S_pad * out_p)
    bytes_accessed = (S_pad * M * 2 + E * C * S_pad * 2 + E * S_pad * C * 2
                      + E * M * mid_p * 2 + E * mid_p * 4
                      + E * mid_p * out_p * 2 + E * out_p * 4
                      + S_pad * out_p * jnp.dtype(out_dtype).itemsize)
    cost = pl.CostEstimate(flops=int(flops), transcendentals=0,
                           bytes_accessed=int(bytes_accessed))

    grid_spec = pltpu.PrefetchScalarGridSpec(
        num_scalar_prefetch=0,
        grid=(n_s, E),                          # experts innermost (accumulated)
        in_specs=[
            pl.BlockSpec((ts, M), lambda i, e: (i, 0)),                       # features
            pl.BlockSpec((pl.Squeezed(), C, ts), lambda i, e: (e, 0, i)),     # dispatch
            pl.BlockSpec((pl.Squeezed(), ts, C), lambda i, e: (e, i, 0)),     # combine
            pl.BlockSpec((pl.Squeezed(), M, mid_p), lambda i, e: (e, 0, 0)),  # W1
            pl.BlockSpec((pl.Squeezed(), 1, mid_p), lambda i, e: (e, 0, 0)),  # b1
            pl.BlockSpec((pl.Squeezed(), mid_p, out_p), lambda i, e: (e, 0, 0)),  # W2
            pl.BlockSpec((pl.Squeezed(), 1, out_p), lambda i, e: (e, 0, 0)),  # b2
        ],
        out_specs=pl.BlockSpec((ts, out_p), lambda i, e: (i, 0)),
        scratch_shapes=[pltpu.VMEM((ts, out_p), jnp.float32)],
    )

    return pl.pallas_call(
        _moe_kernel,
        out_shape=jax.ShapeDtypeStruct((S_pad, out_p), out_dtype),
        grid_spec=grid_spec,
        compiler_params=pltpu.CompilerParams(
            dimension_semantics=("parallel", "arbitrary"),
            vmem_limit_bytes=vmem_limit),
        cost_estimate=cost,
    )(features, disp, comb, w1, b1, w2, b2)


# ----------------------------- JAX-side glue --------------------------------
def top1_gate(features, gate_w, num_experts, capacity):
    """Deterministic top-1 gate producing (l_aux, combine, dispatch), with the
    routing tensors built *directly* in the kernel layouts (E,S,C)/(E,C,S) so
    no large (S,E,C) cube transpose is materialized in HBM."""
    dtype = jnp.float32
    logits = features @ gate_w                                    # (S, E)
    probs = jax.nn.softmax(logits, axis=-1)
    expert_idx = jnp.argmax(probs, axis=-1)                       # (S,)
    gate_val = jnp.take_along_axis(probs, expert_idx[:, None], axis=-1)[:, 0]
    onehot_e = jax.nn.one_hot(expert_idx, num_experts, dtype=dtype)      # (S, E)
    # position of each token within its chosen expert
    pos = jnp.cumsum(onehot_e, axis=0) * onehot_e - onehot_e
    loc = jnp.sum(pos, axis=1).astype(jnp.int32)                         # (S,)
    keep = (loc < capacity).astype(dtype)                  # drop overflow tokens
    onehot_c = jax.nn.one_hot(loc, capacity, dtype=dtype)                # (S, C)

    oe_t = jnp.transpose(onehot_e)                                       # (E, S)
    oc_t = jnp.transpose(onehot_c)                                       # (C, S)
    disp_ecs = oe_t[:, None, :] * oc_t[None, :, :] * keep[None, None, :] # (E,C,S)
    comb_esc = (oe_t[:, :, None]
                * (onehot_c * (gate_val * keep)[:, None])[None, :, :])   # (E,S,C)

    me = jnp.mean(onehot_e, axis=0)
    ce = jnp.mean(probs, axis=0)
    l_aux = num_experts * jnp.sum(me * ce)
    return l_aux, comb_esc, disp_ecs


@functools.partial(jax.jit, static_argnames=("num_experts", "capacity"))
def base_layer_forward(hidden_states, params, *, num_experts, capacity):
    B, T, M = hidden_states.shape
    S = B * T
    features = hidden_states.reshape(S, M)

    # gate (routing, plain JAX; `self.gate` is injected in the original module)
    l_aux, comb_esc, disp_ecs = top1_gate(features, params["gate_w"],
                                          num_experts, capacity)

    mid = params["w1"].shape[-1]
    out = params["w2"].shape[-1]
    mid_p = _round_up(mid, 128)      # lane-dense FFN intermediate
    out_p = _round_up(out, 128)      # lane-dense output (no masked vst.msk)
    ts = _choose_token_tile(S, M, capacity, mid_p, out_p)
    S_pad = _round_up(S, ts)

    bf16 = jnp.bfloat16
    # Pad tokens with zero rows (zero dispatch/combine rows contribute nothing)
    # and cast MXU operands to bf16; accumulation stays f32 inside the kernel.
    feat_p = jnp.pad(features, ((0, S_pad - S), (0, 0))).astype(bf16)
    disp_p = jnp.pad(disp_ecs, ((0, 0), (0, 0), (0, S_pad - S))).astype(bf16)
    comb_p = jnp.pad(comb_esc, ((0, 0), (0, S_pad - S), (0, 0))).astype(bf16)

    # Zero-pad mid/out dims to multiples of 128 (exact: padded rows/cols are 0).
    w1 = jnp.pad(params["w1"], ((0, 0), (0, 0), (0, mid_p - mid))).astype(bf16)
    b1 = jnp.pad(params["b1"], ((0, 0), (0, 0), (0, mid_p - mid))).astype(jnp.float32)
    w2 = jnp.pad(params["w2"],
                 ((0, 0), (0, mid_p - mid), (0, out_p - out))).astype(bf16)
    b2 = jnp.pad(params["b2"], ((0, 0), (0, 0), (0, out_p - out))).astype(jnp.float32)

    combined = _moe_pallas(feat_p, disp_p, comb_p, w1, b1, w2, b2, ts,
                           hidden_states.dtype)               # (S_pad, out_p)
    combined = combined[:S, :out]
    return combined.reshape(B, T, out), l_aux


# ------------------------------- reference ----------------------------------
def base_layer_reference(hidden_states, params, *, num_experts, capacity):
    """Pure-JAX reference mirroring the module math (and the bf16 operand
    casts used by the kernel, with f32 accumulation)."""
    B, T, M = hidden_states.shape
    S = B * T
    features = hidden_states.reshape(S, M)
    l_aux, comb_esc, disp_ecs = top1_gate(features, params["gate_w"],
                                          num_experts, capacity)
    bf = jnp.bfloat16
    f_bf = features.astype(bf)
    disp_bf = disp_ecs.astype(bf)
    comb_bf = comb_esc.astype(bf)
    w1 = params["w1"].astype(bf)
    w2 = params["w2"].astype(bf)
    x = jnp.einsum("ecs,sm->ecm", disp_bf, f_bf,
                   preferred_element_type=jnp.float32)              # (E, C, M)
    h = jnp.maximum(
        jnp.einsum("ecm,emh->ech", x.astype(bf), w1,
                   preferred_element_type=jnp.float32) + params["b1"], 0.0)
    y = jnp.einsum("ech,eho->eco", h.astype(bf), w2,
                   preferred_element_type=jnp.float32) + params["b2"]
    combined = jnp.einsum("esc,eco->so", comb_bf, y.astype(bf),
                          preferred_element_type=jnp.float32)       # (S, out)
    return combined.reshape(B, T, -1).astype(hidden_states.dtype), l_aux


# --------------------------------- main --------------------------------------
if __name__ == "__main__":
    # small shapes consistent with the module
    B, T = 2, 8
    in_features = 32      # M
    mid_features = 64
    out_features = 32
    E = 8                 # moe_expert_count
    C = 8                 # expert capacity

    key = jax.random.PRNGKey(0)
    kx, kg, k1, k2, k3, k4 = jax.random.split(key, 6)

    hidden_states = jax.random.normal(kx, (B, T, in_features), dtype=jnp.float32)
    params = {
        "gate_w": jax.random.normal(kg, (in_features, E), jnp.float32) * 0.1,
        "w1": jax.random.normal(k1, (E, in_features, mid_features), jnp.float32)
              * (1.0 / jnp.sqrt(in_features)),
        "b1": jax.random.normal(k2, (E, 1, mid_features), jnp.float32) * 0.01,
        "w2": jax.random.normal(k3, (E, mid_features, out_features), jnp.float32)
              * (1.0 / jnp.sqrt(mid_features)),
        "b2": jax.random.normal(k4, (E, 1, out_features), jnp.float32) * 0.01,
    }

    out, l_aux = base_layer_forward(hidden_states, params,
                                    num_experts=E, capacity=C)
    out = jax.block_until_ready(out)
    l_aux = jax.block_until_ready(l_aux)

    ref_out, ref_laux = base_layer_reference(hidden_states, params,
                                             num_experts=E, capacity=C)
    assert out.shape == (B, T, out_features), out.shape
    assert jnp.allclose(out, ref_out, atol=5e-3, rtol=5e-3), "output mismatch"
    assert jnp.allclose(l_aux, ref_laux, atol=1e-5), "l_aux mismatch"

    print("KERNEL_OK")
</pallas_src>

<mosaic_0001>
module attributes {stable_mosaic.version = 11 : i64} {
  func.func @_moe_kernel(%arg0: i32, %arg1: i32, %arg2: memref<128x32xbf16, #tpu.memory_space<vmem>>, %arg3: memref<1x8x128xbf16, #tpu.memory_space<vmem>>, %arg4: memref<1x128x8xbf16, #tpu.memory_space<vmem>>, %arg5: memref<1x32x128xbf16, #tpu.memory_space<vmem>>, %arg6: memref<1x1x128xf32, #tpu.memory_space<vmem>>, %arg7: memref<1x128x128xbf16, #tpu.memory_space<vmem>>, %arg8: memref<1x1x128xf32, #tpu.memory_space<vmem>>, %arg9: memref<128x128xf32, #tpu.memory_space<vmem>>, %arg10: memref<128x128xf32, #tpu.memory_space<vmem>>) attributes {dimension_semantics = [#tpu.dimension_semantics<parallel>, #tpu.dimension_semantics<arbitrary>], iteration_bounds = array<i64: 1, 8>, scalar_prefetch = 0 : i64, scratch_operands = 1 : i64, tpu.core_type = #tpu.core_type<tc>, window_params = [{transform_indices = @transform_0, window_bounds = array<i64: 128, 32>}, {transform_indices = @transform_1, window_bounds = array<i64: 1, 8, 128>}, {transform_indices = @transform_2, window_bounds = array<i64: 1, 128, 8>}, {transform_indices = @transform_3, window_bounds = array<i64: 1, 32, 128>}, {transform_indices = @transform_4, window_bounds = array<i64: 1, 1, 128>}, {transform_indices = @transform_5, window_bounds = array<i64: 1, 128, 128>}, {transform_indices = @transform_6, window_bounds = array<i64: 1, 1, 128>}, {transform_indices = @transform_7, window_bounds = array<i64: 128, 128>}]} {
    %c0_i32 = arith.constant 0 : i32
    %0 = arith.cmpi eq, %arg1, %c0_i32 : i32
    %1 = arith.extui %0 : i1 to i32
    %c0_i32_0 = arith.constant 0 : i32
    %2 = arith.cmpi ne, %1, %c0_i32_0 : i32
    scf.if %2 {
      %cst_29 = arith.constant 0.000000e+00 : f32
      %35 = vector.broadcast %cst_29 : f32 to vector<128x128xf32>
      %c0_30 = arith.constant 0 : index
      %c0_31 = arith.constant 0 : index
      %36 = vector.load %arg10[%c0_30, %c0_31] : memref<128x128xf32, #tpu.memory_space<vmem>>, vector<128x128xf32>
      tpu.vector_store %arg10[%c0_30, %c0_31], %35 {strides = array<i32>} : memref<128x128xf32, #tpu.memory_space<vmem>>, vector<128x128xf32>,
    } else {
    }
    %c0 = arith.constant 0 : index
    %c0_1 = arith.constant 0 : index
    %c0_2 = arith.constant 0 : index
    %3 = vector.load %arg3[%c0, %c0_1, %c0_2] : memref<1x8x128xbf16, #tpu.memory_space<vmem>>, vector<1x8x128xbf16>
    %4 = vector.shape_cast %3 : vector<1x8x128xbf16> to vector<8x128xbf16>
    %c0_3 = arith.constant 0 : index
    %c0_4 = arith.constant 0 : index
    %5 = vector.load %arg2[%c0_3, %c0_4] : memref<128x32xbf16, #tpu.memory_space<vmem>>, vector<128x32xbf16>
    %cst = arith.constant dense<0.000000e+00> : vector<8x32xf32>
    %6 = tpu.matmul %4, %5, %cst {dimension_numbers = #tpu.dot_dimension_numbers<[1], [0], [0], [1], [0, 0, 1, 1], [], []>} : vector<8x128xbf16>, vector<128x32xbf16>, vector<8x32xf32> -> vector<8x32xf32>
    %7 = arith.truncf %6 : vector<8x32xf32> to vector<8x32xbf16>
    %c0_5 = arith.constant 0 : index
    %c0_6 = arith.constant 0 : index
    %c0_7 = arith.constant 0 : index
    %8 = vector.load %arg5[%c0_5, %c0_6, %c0_7] : memref<1x32x128xbf16, #tpu.memory_space<vmem>>, vector<1x32x128xbf16>
    %9 = vector.shape_cast %8 : vector<1x32x128xbf16> to vector<32x128xbf16>
    %cst_8 = arith.constant dense<0.000000e+00> : vector<8x128xf32>
    %10 = tpu.matmul %7, %9, %cst_8 {dimension_numbers = #tpu.dot_dimension_numbers<[1], [0], [0], [1], [0, 0, 1, 1], [], []>} : vector<8x32xbf16>, vector<32x128xbf16>, vector<8x128xf32> -> vector<8x128xf32>
    %c0_9 = arith.constant 0 : index
    %c0_10 = arith.constant 0 : index
    %c0_11 = arith.constant 0 : index
    %11 = vector.load %arg6[%c0_9, %c0_10, %c0_11] : memref<1x1x128xf32, #tpu.memory_space<vmem>>, vector<1x1x128xf32>
    %12 = vector.shape_cast %11 : vector<1x1x128xf32> to vector<1x128xf32>
    %13 = vector.broadcast %12 : vector<1x128xf32> to vector<8x128xf32>
    %14 = arith.addf %10, %13 : vector<8x128xf32>
    %cst_12 = arith.constant 0.000000e+00 : f32
    %15 = vector.broadcast %cst_12 : f32 to vector<8x128xf32>
    %16 = arith.maximumf %14, %15 : vector<8x128xf32>
    %17 = arith.truncf %16 : vector<8x128xf32> to vector<8x128xbf16>
    %c0_13 = arith.constant 0 : index
    %c0_14 = arith.constant 0 : index
    %c0_15 = arith.constant 0 : index
    %18 = vector.load %arg7[%c0_13, %c0_14, %c0_15] : memref<1x128x128xbf16, #tpu.memory_space<vmem>>, vector<1x128x128xbf16>
    %19 = vector.shape_cast %18 : vector<1x128x128xbf16> to vector<128x128xbf16>
    %cst_16 = arith.constant dense<0.000000e+00> : vector<8x128xf32>
    %20 = tpu.matmul %17, %19, %cst_16 {dimension_numbers = #tpu.dot_dimension_numbers<[1], [0], [0], [1], [0, 0, 1, 1], [], []>} : vector<8x128xbf16>, vector<128x128xbf16>, vector<8x128xf32> -> vector<8x128xf32>
    %c0_17 = arith.constant 0 : index
    %c0_18 = arith.constant 0 : index
    %c0_19 = arith.constant 0 : index
    %21 = vector.load %arg8[%c0_17, %c0_18, %c0_19] : memref<1x1x128xf32, #tpu.memory_space<vmem>>, vector<1x1x128xf32>
    %22 = vector.shape_cast %21 : vector<1x1x128xf32> to vector<1x128xf32>
    %23 = vector.broadcast %22 : vector<1x128xf32> to vector<8x128xf32>
    %24 = arith.addf %20, %23 : vector<8x128xf32>
    %c0_20 = arith.constant 0 : index
    %c0_21 = arith.constant 0 : index
    %25 = vector.load %arg10[%c0_20, %c0_21] : memref<128x128xf32, #tpu.memory_space<vmem>>, vector<128x128xf32>
    %c0_22 = arith.constant 0 : index
    %c0_23 = arith.constant 0 : index
    %c0_24 = arith.constant 0 : index
    %26 = vector.load %arg4[%c0_22, %c0_23, %c0_24] : memref<1x128x8xbf16, #tpu.memory_space<vmem>>, vector<1x128x8xbf16>
    %27 = vector.shape_cast %26 : vector<1x128x8xbf16> to vector<128x8xbf16>
    %28 = arith.truncf %24 : vector<8x128xf32> to vector<8x128xbf16>
    %cst_25 = arith.constant dense<0.000000e+00> : vector<128x128xf32>
    %29 = tpu.matmul %27, %28, %cst_25 {dimension_numbers = #tpu.dot_dimension_numbers<[1], [0], [0], [1], [0, 0, 1, 1], [], []>} : vector<128x8xbf16>, vector<8x128xbf16>, vector<128x128xf32> -> vector<128x128xf32>
    %30 = arith.addf %25, %29 : vector<128x128xf32>
    %c0_26 = arith.constant 0 : index
    %c0_27 = arith.constant 0 : index
    %31 = vector.load %arg10[%c0_26, %c0_27] : memref<128x128xf32, #tpu.memory_space<vmem>>, vector<128x128xf32>
    tpu.vector_store %arg10[%c0_26, %c0_27], %30 {strides = array<i32>} : memref<128x128xf32, #tpu.memory_space<vmem>>, vector<128x128xf32>,
    %c7_i32 = arith.constant 7 : i32
    %32 = arith.cmpi eq, %arg1, %c7_i32 : i32
    %33 = arith.extui %32 : i1 to i32
    %c0_i32_28 = arith.constant 0 : i32
    %34 = arith.cmpi ne, %33, %c0_i32_28 : i32
    scf.if %34 {
      %c0_29 = arith.constant 0 : index
      %c0_30 = arith.constant 0 : index
      %35 = vector.load %arg10[%c0_29, %c0_30] : memref<128x128xf32, #tpu.memory_space<vmem>>, vector<128x128xf32>
      %c0_31 = arith.constant 0 : index
      %c0_32 = arith.constant 0 : index
      %36 = vector.load %arg9[%c0_31, %c0_32] : memref<128x128xf32, #tpu.memory_space<vmem>>, vector<128x128xf32>
      tpu.vector_store %arg9[%c0_31, %c0_32], %35 {strides = array<i32>} : memref<128x128xf32, #tpu.memory_space<vmem>>, vector<128x128xf32>,
    } else {
    }
    return
  }
  func.func @transform_0(%arg0: i32, %arg1: i32) -> (i32, i32) {
    %c0_i32 = arith.constant 0 : i32
    %c0_i32_0 = arith.constant 0 : i32
    return %arg0, %c0_i32 : i32, i32
  }
  func.func @transform_1(%arg0: i32, %arg1: i32) -> (i32, i32, i32) {
    %c0_i32 = arith.constant 0 : i32
    %c0_i32_0 = arith.constant 0 : i32
    return %arg1, %c0_i32, %arg0 : i32, i32, i32
  }
  func.func @transform_2(%arg0: i32, %arg1: i32) -> (i32, i32, i32) {
    %c0_i32 = arith.constant 0 : i32
    %c0_i32_0 = arith.constant 0 : i32
    return %arg1, %arg0, %c0_i32 : i32, i32, i32
  }
  func.func @transform_3(%arg0: i32, %arg1: i32) -> (i32, i32, i32) {
    %c0_i32 = arith.constant 0 : i32
    %c0_i32_0 = arith.constant 0 : i32
    %c0_i32_1 = arith.constant 0 : i32
    return %arg1, %c0_i32, %c0_i32_0 : i32, i32, i32
  }
  func.func @transform_4(%arg0: i32, %arg1: i32) -> (i32, i32, i32) {
    %c0_i32 = arith.constant 0 : i32
    %c0_i32_0 = arith.constant 0 : i32
    %c0_i32_1 = arith.constant 0 : i32
    return %arg1, %c0_i32, %c0_i32_0 : i32, i32, i32
  }
  func.func @transform_5(%arg0: i32, %arg1: i32) -> (i32, i32, i32) {
    %c0_i32 = arith.constant 0 : i32
    %c0_i32_0 = arith.constant 0 : i32
    %c0_i32_1 = arith.constant 0 : i32
    return %arg1, %c0_i32, %c0_i32_0 : i32, i32, i32
  }
  func.func @transform_6(%arg0: i32, %arg1: i32) -> (i32, i32, i32) {
    %c0_i32 = arith.constant 0 : i32
    %c0_i32_0 = arith.constant 0 : i32
    %c0_i32_1 = arith.constant 0 : i32
    return %arg1, %c0_i32, %c0_i32_0 : i32, i32, i32
  }
  func.func @transform_7(%arg0: i32, %arg1: i32) -> (i32, i32) {
    %c0_i32 = arith.constant 0 : i32
    %c0_i32_0 = arith.constant 0 : i32
    return %arg0, %c0_i32 : i32, i32
  }
}

</mosaic_0001>

<bundles_post_ra>
// kernel: base_layer_forward.1
= control target key start
LH: loop header
LB: loop body
LE: loop exit
PB: predicated region body
PF: predicated region fallthrough
CT: control target
= control target key end

     0   :  { %s1258_s24 = smov 0   ;;  %s1260_s25 = smov 0   ;;  %s1425_s0 = inlined_call_operand.vmem [shape: bf16[128,32], index: 0, kind: input, shape index: {}]   ;;  %s1426_s1 = inlined_call_operand.vmem [shape: bf16[8,8,128], index: 1, kind: input, shape index: {}]   ;;  %s1427_s2 = inlined_call_operand.vmem [shape: bf16[8,128,8], index: 2, kind: input, shape index: {}]   ;;  %s1428_s3 = inlined_call_operand.vmem [shape: bf16[8,32,128], index: 3, kind: input, shape index: {}]   ;;  %s1429_s4 = inlined_call_operand.vmem [shape: f32[8,1,128], index: 4, kind: input, shape index: {}]   ;;  %s1430_s5 = inlined_call_operand.vmem [shape: bf16[8,128,128], index: 5, kind: input, shape index: {}]   ;;  %s1431_s6 = inlined_call_operand.vmem [shape: f32[8,1,128], index: 6, kind: input, shape index: {}]   ;;  %s1432_s7 = inlined_call_operand.vmem [shape: f32[128,128], index: 7, kind: output, shape index: {}]  }
   0x1   :  { %s1262_s26 = smov 0  }
   0x2 LB: > { %s26_s27 = sadd.s32 1, %s1211_s25  ;;  %p1009_p0 = scmp.ge.s32.totalorder %s1215_s26, 1  ;;  %s1215_s26 = sphi %s1262_s26, %s17_s26   ;;  %s1211_s25 = sphi %s1260_s25, %s1434_s25   ;;  %s1207_s24 = sphi %s1258_s24, %s1433_s24  }
   0x3   : > { %p27_p1 = scmp.ge.s32.totalorder %s26_s27, 8  ;;  %p317_p2 = scmp.lt.s32.totalorder %s1215_s26, 9 }
   0x5   : > { %s1436_s27 = smov (%p27_p1, %s26_s27), 0  ;;  %p318_p3 = pnand %p1009_p0, %p317_p2 }
   0x6   : > { %p387_p4 = scmp.lt.s32.totalorder (!%p318_p3), %s1207_s24, 7  ;;  %p1017_p5 = scmp.ne.s32.totalorder (!%p318_p3), %s1207_s24, 0 }
   0x7   : > { %321 = sbr.rel (%p318_p3) target bundleno = 680 (0x2a8), region = 48 }
   0xc   : > { %s1280_s28 = scalar_select %p387_p4, %s1207_s24, 7 }
   0xe   : > { %s1010_s29 = sshll.u32 %s1280_s28, 2  ;;  %s1136_s30 = sshll.u32 %s1280_s28, 6 }
   0xf   : > { %s1287_s10 = scalar_lea.vmem %s1426_s1, %s1010_s29  ;;  %s1292_s13 = scalar_lea.vmem %s1427_s2, %s1136_s30 }
  0x10   : > { %s1137_s14 = sshll.u32 %s1280_s28, 4  ;;  %s411_s17 = scalar_lea.vmem %s1429_s4, %s1280_s28 }
  0x11   : > { %s1302_s20 = scalar_lea.vmem %s1428_s3, %s1137_s14  ;;  %s1307_s23 = scalar_lea.vmem %s1430_s5, %s1136_s30 }
  0x12   : > { %s419_s9 = scalar_lea.vmem %s1431_s6, %s1280_s28  ;;  %430 = sbr.rel (%p1017_p5) target bundleno = 40 (0x28), region = 52 }
  0x17   : > { %v1217_v0 = vmov 0.0  }
  0x18   : > { %431 = vst [vmem:[#allocation2 + $0x30] sm:$0xff] %v1217_v0 }
  0x19   : > { %432 = vst [vmem:[#allocation2] sm:$0xff] %v1217_v0 }
  0x1a   : > { %433 = vst [vmem:[#allocation2 + $0x58] sm:$0xff] %v1217_v0 }
  0x1b   : > { %434 = vst [vmem:[#allocation2 + $0x18] sm:$0xff] %v1217_v0 }
  0x1c   : > { %435 = vst [vmem:[#allocation2 + $0x50] sm:$0xff] %v1217_v0 }
  0x1d   : > { %436 = vst [vmem:[#allocation2 + $0x68] sm:$0xff] %v1217_v0 }
  0x1e   : > { %437 = vst [vmem:[#allocation2 + $0x8] sm:$0xff] %v1217_v0 }
  0x1f   : > { %438 = vst [vmem:[#allocation2 + $0x48] sm:$0xff] %v1217_v0 }
  0x20   : > { %439 = vst [vmem:[#allocation2 + $0x40] sm:$0xff] %v1217_v0 }
  0x21   : > { %440 = vst [vmem:[#allocation2 + $0x20] sm:$0xff] %v1217_v0 }
  0x22   : > { %441 = vst [vmem:[#allocation2 + $0x10] sm:$0xff] %v1217_v0 }
  0x23   : > { %442 = vst [vmem:[#allocation2 + $0x38] sm:$0xff] %v1217_v0 }
  0x24   : > { %443 = vst [vmem:[#allocation2 + $0x60] sm:$0xff] %v1217_v0 }
  0x25   : > { %444 = vst [vmem:[#allocation2 + $0x70] sm:$0xff] %v1217_v0 }
  0x26   : > { %445 = vst [vmem:[#allocation2 + $0x78] sm:$0xff] %v1217_v0 }
  0x27   : > { %446 = vst [vmem:[#allocation2 + $0x28] sm:$0xff] %v1217_v0 }
  0x28 PF: > { %v1146_v1 = vld [vmem:[%s1425_s0 + $0x38] sm:$0xff]  ;;  %v1145_v2 = vld [vmem:[%s1425_s0 + $0x30] sm:$0xff]  ;;  %v1144_v3 = vld [vmem:[%s1425_s0 + $0x28] sm:$0xff]  ;;  %vm546_vm0 = vcmask 261120   ;;  %vm744_vm1 = vcmask 1043456   ;;  %vm719_vm2 = vcmask 64512  }
  0x29   : > { %512 = vmatpush.bf16.msra.mxu0 %v1146_v1  ;;  %v1143_v4 = vld [vmem:[%s1425_s0 + $0x20] sm:$0xff]  ;;  %v1142_v5 = vld [vmem:[%s1425_s0 + $0x18] sm:$0xff]  ;;  %v1141_v6 = vld [vmem:[%s1425_s0 + $0x10] sm:$0xff]  ;;  %p1131_p6 = scmp.ne.s32.totalorder %s1207_s24, 7 }
  0x2a   : > { %v1140_v7 = vld [vmem:[%s1425_s0 + $0x8] sm:$0xff]  ;;  %v1139_v8 = vld [vmem:[%s1425_s0] sm:$0xff]  ;;  %v1156_v12 = vld [vmem:[%s1307_s23 + $0x38] sm:$0xff] }
  0x2b   : > { %v1148_v9 = vld [vmem:[%s1302_s20 + $0x8] sm:$0xff]  ;;  %v447_v10 = vld [vmem:[%s1287_s10] sm:$0xf]  ;;  %633 = vmatpush.bf16.msra.mxu2 %v1156_v12  ;;  %v1155_v13 = vld [vmem:[%s1307_s23 + $0x30] sm:$0xff] }
  0x2c   : > { %v1147_v11 = vld [vmem:[%s1302_s20] sm:$0xff]  ;;  %v1154_v14 = vld [vmem:[%s1307_s23 + $0x28] sm:$0xff]  ;;  %v1152_v16 = vld [vmem:[%s1307_s23 + $0x18] sm:$0xff] }
  0x2d   : > { %513 = vmatpush.bf16.msra.mxu0 %v1145_v2  ;;  %v1153_v15 = vld [vmem:[%s1307_s23 + $0x20] sm:$0xff]  ;;  %v1151_v17 = vld [vmem:[%s1307_s23 + $0x10] sm:$0xff]  ;;  %v1150_v21 = vld [vmem:[%s1307_s23 + $0x8] sm:$0xff] }
  0x2e   : > { %v1149_v22 = vld [vmem:[%s1307_s23] sm:$0xff]  ;;  %v1158_v37 = vld [vmem:[%s1292_s13 + $0x8] sm:$0xff]  ;;  %v1159_v39 = vld [vmem:[%s1292_s13 + $0x10] sm:$0xff] }
  0x2f   : > { %634 = vmatpush.bf16.msra.mxu2 %v1155_v13  ;;  %v1191_v23 = vld [vmem:[%s411_s17] ss:$0 sm:$0xff]  ;;  %v1162_v38 = vld [vmem:[%s1292_s13 + $0x28] sm:$0xff]  ;;  %v1163_v40 = vld [vmem:[%s1292_s13 + $0x30] sm:$0xff] }
  0x30   : > { %v1192_v29 = vld [vmem:[%s419_s9] ss:$0 sm:$0xff]  ;;  %v1160_v41 = vld [vmem:[%s1292_s13 + $0x18] sm:$0xff]  ;;  %v646_v43 = vld [vmem:[#allocation2 + $0x30] sm:$0xff] }
  0x31   : > { %514 = vmatpush.bf16.msra.mxu0 %v1144_v3  ;;  %v1157_v34 = vld [vmem:[%s1292_s13] sm:$0xff]  ;;  %v1164_v42 = vld [vmem:[%s1292_s13 + $0x38] sm:$0xff]  ;;  %v656_v58 = vld [vmem:[#allocation2 + $0x10] sm:$0xff] }
  0x32   : > { %v1161_v35 = vld [vmem:[%s1292_s13 + $0x20] sm:$0xff]  ;;  %v648_v54 = vld [vmem:[#allocation2 + $0x58] sm:$0xff]  ;;  %v650_v2 = vld [vmem:[#allocation2 + $0x50] sm:$0xff] }
  0x33   : > { %635 = vmatpush.bf16.msra.mxu2 %v1154_v14  ;;  %v654_v46 = vld [vmem:[#allocation2 + $0x40] sm:$0xff]  ;;  %v649_v60 = vld [vmem:[#allocation2 + $0x18] sm:$0xff]  ;;  %v659_v12 = vld [vmem:[#allocation2 + $0x70] sm:$0xff] }
  0x34   : > { %v647_v48 = vld [vmem:[#allocation2] sm:$0xff]  ;;  %v657_v0 = vld [vmem:[#allocation2 + $0x38] sm:$0xff]  ;;  %v652_v14 = vld [vmem:[#allocation2 + $0x8] sm:$0xff] }
  0x35   : > { %515 = vmatpush.bf16.msra.mxu0 %v1143_v4  ;;  %v655_v52 = vld [vmem:[#allocation2 + $0x20] sm:$0xff] }
  0x37   : > { %636 = vmatpush.bf16.msra.mxu2 %v1153_v15 }
  0x39   : > { %516 = vmatpush.bf16.msra.mxu0 %v1142_v5 }
  0x3b   : > { %637 = vmatpush.bf16.msra.mxu2 %v1152_v16 }
  0x3d   : > { %517 = vmatpush.bf16.msra.mxu0 %v1141_v6  ;;  %v658_v6 = vld [vmem:[#allocation2 + $0x60] sm:$0xff] }
  0x3f   : > { %638 = vmatpush.bf16.msra.mxu2 %v1151_v17 }
  0x41   : > { %518 = vmatpush.bf16.msra.mxu0 %v1140_v7 }
  0x43   : > { %639 = vmatpush.bf16.msra.mxu2 %v1150_v21 }
  0x45   : > { %519 = vmatpush.bf16.msra.mxu0 %v1139_v8  ;;  %v651_v8 = vld [vmem:[#allocation2 + $0x68] sm:$0xff] }
  0x47   : > { %640 = vmatpush.bf16.msra.mxu2 %v1149_v22 }
  0x48   : > { %520 = vmatmul.bf16.vlgmr.msra.gmra.mxu0 %v447_v10 }
  0x49   : > { %556 = vmatpush.bf16.msrb.mxu0 %v1148_v9 }
  0x4d   : > { %557 = vmatpush.bf16.msrb.mxu0 %v1147_v11 }
  0xc5   : > { %v521_v18 = vpop.f32.mrf.mxu0 }
  0xc6   : > { %v525_v19 = vpack.c.bf16 %v521_v18, %v521_v18  ;;  %v660_v18 = vld [vmem:[#allocation2 + $0x78] sm:$0xff] }
  0xc8   : > { %1058 = vmatmul.msk.bf16.vlgmr.msrb.gmra.mxu0 %vm546_vm0, %v525_v19 }
  0xcd   : > { %v523_v20 = vpop.f32.mrf.mxu0 }
  0xce   : > { %v653_v20 = vld [vmem:[#allocation2 + $0x48] sm:$0xff] }
 0x145   : > { %v559_v24 = vpop.f32.mrf.mxu0 }
 0x146   : > { %v560_v25 = vadd.f32 %v1191_v23, %v559_v24  ;;  %v661_v24 = vld [vmem:[#allocation2 + $0x28] sm:$0xff] }
 0x148   : > { %v563_v26 = vmax.f32 %v560_v25, 0.0 }
 0x14a   : > { %v564_v27 = vpack.c.bf16 %v563_v26, %v563_v26 }
 0x14c   : > { %641 = vmatmul.bf16.vlgmr.msra.gmra.mxu2 %v564_v27 }
 0x14d   : > { %v561_v28 = vpop.f32.mrf.mxu0 }
 0x1cf   : > { %v642_v30 = vpop.f32.mrf.mxu2 }
 0x1d0   : > { %v643_v31 = vadd.f32 %v1192_v29, %v642_v30 }
 0x1d2   : > { %v678_v32 = vpack.c.bf16 %v643_v31, %v643_v31 }
 0x1d4   : > { %v746_v33 = vsel %vm744_vm1, %v678_v32, 0 }
 0x1d5   : > { %755 = vmatpush.bf16.msra.mxu1 %v746_v33  ;;  %1165 = vmatpush.bf16.msra.mxu3 %v746_v33 }
 0x1d7   : > { %v644_v36 = vpop.f32.mrf.mxu2 }
 0x1d8   : > { %1123 = vmatmul.msk.bf16.vlgmr.msra.gmra.mxu1 %vm719_vm2, %v1157_v34  ;;  %1127 = vmatmul.msk.bf16.vlgmr.msra.gmra.mxu3 %vm719_vm2, %v1161_v35 }
 0x1e8   : > { %1124 = vmatmul.msk.bf16.gmra.mxu1 %vm719_vm2, %v1158_v37  ;;  %1128 = vmatmul.msk.bf16.gmra.mxu3 %vm719_vm2, %v1162_v38 }
 0x1f8   : > { %1125 = vmatmul.msk.bf16.gmra.mxu1 %vm719_vm2, %v1159_v39  ;;  %1129 = vmatmul.msk.bf16.gmra.mxu3 %vm719_vm2, %v1163_v40 }
 0x208   : > { %1126 = vmatmul.msk.bf16.gmra.mxu1 %vm719_vm2, %v1160_v41  ;;  %1130 = vmatmul.msk.bf16.gmra.mxu3 %vm719_vm2, %v1164_v42 }
 0x255   : > { %v757_v44 = vpop.f32.mrf.mxu1 }
 0x256   : > { %v797_v45 = vadd.f32 %v757_v44, %v646_v43 }
 0x258   : > { %813 = vst [vmem:[#allocation2 + $0x30] sm:$0xff] %v797_v45 }
 0x25b   : > { %v777_v47 = vpop.f32.mrf.mxu3 }
 0x25c   : > { %v805_v49 = vadd.f32 %v777_v47, %v654_v46 }
 0x25d   : > { %v759_v50 = vpop.f32.mrf.mxu1 }
 0x25e   : > { %821 = vst [vmem:[#allocation2 + $0x40] sm:$0xff] %v805_v49  ;;  %v798_v51 = vadd.f32 %v759_v50, %v647_v48 }
 0x260   : > { %814 = vst [vmem:[#allocation2] sm:$0xff] %v798_v51 }
 0x263   : > { %v779_v53 = vpop.f32.mrf.mxu3 }
 0x264   : > { %v806_v55 = vadd.f32 %v779_v53, %v655_v52 }
 0x265   : > { %v762_v56 = vpop.f32.mrf.mxu1 }
 0x266   : > { %822 = vst [vmem:[#allocation2 + $0x20] sm:$0xff] %v806_v55  ;;  %v799_v57 = vadd.f32 %v762_v56, %v648_v54 }
 0x268   : > { %815 = vst [vmem:[#allocation2 + $0x58] sm:$0xff] %v799_v57 }
 0x26b   : > { %v782_v59 = vpop.f32.mrf.mxu3 }
 0x26c   : > { %v807_v61 = vadd.f32 %v782_v59, %v656_v58 }
 0x26d   : > { %v764_v62 = vpop.f32.mrf.mxu1 }
 0x26e   : > { %823 = vst [vmem:[#allocation2 + $0x10] sm:$0xff] %v807_v61  ;;  %v800_v63 = vadd.f32 %v764_v62, %v649_v60 }
 0x270   : > { %816 = vst [vmem:[#allocation2 + $0x18] sm:$0xff] %v800_v63 }
 0x273   : > { %v784_v1 = vpop.f32.mrf.mxu3 }
 0x274   : > { %v808_v3 = vadd.f32 %v784_v1, %v657_v0 }
 0x275   : > { %v767_v4 = vpop.f32.mrf.mxu1 }
 0x276   : > { %824 = vst [vmem:[#allocation2 + $0x38] sm:$0xff] %v808_v3  ;;  %v801_v5 = vadd.f32 %v767_v4, %v650_v2 }
 0x278   : > { %817 = vst [vmem:[#allocation2 + $0x50] sm:$0xff] %v801_v5 }
 0x27b   : > { %v787_v7 = vpop.f32.mrf.mxu3 }
 0x27c   : > { %v809_v9 = vadd.f32 %v787_v7, %v658_v6 }
 0x27d   : > { %v769_v10 = vpop.f32.mrf.mxu1 }
 0x27e   : > { %825 = vst [vmem:[#allocation2 + $0x60] sm:$0xff] %v809_v9  ;;  %v802_v11 = vadd.f32 %v769_v10, %v651_v8 }
 0x280   : > { %818 = vst [vmem:[#allocation2 + $0x68] sm:$0xff] %v802_v11 }
 0x283   : > { %v789_v13 = vpop.f32.mrf.mxu3 }
 0x284   : > { %v810_v15 = vadd.f32 %v789_v13, %v659_v12 }
 0x285   : > { %v772_v16 = vpop.f32.mrf.mxu1 }
 0x286   : > { %826 = vst [vmem:[#allocation2 + $0x70] sm:$0xff] %v810_v15  ;;  %v803_v17 = vadd.f32 %v772_v16, %v652_v14 }
 0x288   : > { %819 = vst [vmem:[#allocation2 + $0x8] sm:$0xff] %v803_v17 }
 0x28b   : > { %v792_v19 = vpop.f32.mrf.mxu3 }
 0x28c   : > { %v811_v21 = vadd.f32 %v792_v19, %v660_v18 }
 0x28d   : > { %v774_v22 = vpop.f32.mrf.mxu1 }
 0x28e   : > { %827 = vst [vmem:[#allocation2 + $0x78] sm:$0xff] %v811_v21  ;;  %v804_v23 = vadd.f32 %v774_v22, %v653_v20 }
 0x290   : > { %820 = vst [vmem:[#allocation2 + $0x48] sm:$0xff] %v804_v23 }
 0x292   : > { %832 = sbr.rel (%p1131_p6) target bundleno = 680 (0x2a8), region = 56 }
 0x293   : > { %v794_v25 = vpop.f32.mrf.mxu3 }
 0x294   : > { %v812_v26 = vadd.f32 %v794_v25, %v661_v24 }
 0x296   : > { %828 = vst [vmem:[#allocation2 + $0x28] sm:$0xff] %v812_v26 }
 0x297   : > { %v833_v27 = vld [vmem:[#allocation2 + $0x30] sm:$0xff]  ;;  %v834_v28 = vld [vmem:[#allocation2] sm:$0xff]  ;;  %v835_v29 = vld [vmem:[#allocation2 + $0x58] sm:$0xff] }
 0x298   : > { %849 = vst [vmem:[%s1432_s7] sm:$0xff] %v833_v27  ;;  %v836_v30 = vld [vmem:[#allocation2 + $0x18] sm:$0xff]  ;;  %v837_v31 = vld [vmem:[#allocation2 + $0x50] sm:$0xff]  ;;  %v838_v32 = vld [vmem:[#allocation2 + $0x68] sm:$0xff] }
 0x299   : > { %850 = vst [vmem:[%s1432_s7 + $0x8] sm:$0xff] %v834_v28  ;;  %v839_v33 = vld [vmem:[#allocation2 + $0x8] sm:$0xff]  ;;  %v841_v35 = vld [vmem:[#allocation2 + $0x40] sm:$0xff]  ;;  %v843_v37 = vld [vmem:[#allocation2 + $0x10] sm:$0xff] }
 0x29a   : > { %851 = vst [vmem:[%s1432_s7 + $0x10] sm:$0xff] %v835_v29  ;;  %v840_v34 = vld [vmem:[#allocation2 + $0x48] sm:$0xff]  ;;  %v842_v36 = vld [vmem:[#allocation2 + $0x20] sm:$0xff]  ;;  %v844_v38 = vld [vmem:[#allocation2 + $0x38] sm:$0xff] }
 0x29b   : > { %852 = vst [vmem:[%s1432_s7 + $0x18] sm:$0xff] %v836_v30  ;;  %v845_v39 = vld [vmem:[#allocation2 + $0x60] sm:$0xff]  ;;  %v846_v40 = vld [vmem:[#allocation2 + $0x70] sm:$0xff]  ;;  %v847_v41 = vld [vmem:[#allocation2 + $0x78] sm:$0xff] }
 0x29c   : > { %853 = vst [vmem:[%s1432_s7 + $0x20] sm:$0xff] %v837_v31 }
 0x29d   : > { %854 = vst [vmem:[%s1432_s7 + $0x28] sm:$0xff] %v838_v32  ;;  %v848_v42 = vld [vmem:[#allocation2 + $0x28] sm:$0xff] }
 0x29e   : > { %855 = vst [vmem:[%s1432_s7 + $0x30] sm:$0xff] %v839_v33 }
 0x29f   : > { %856 = vst [vmem:[%s1432_s7 + $0x38] sm:$0xff] %v840_v34 }
 0x2a0   : > { %857 = vst [vmem:[%s1432_s7 + $0x40] sm:$0xff] %v841_v35 }
 0x2a1   : > { %858 = vst [vmem:[%s1432_s7 + $0x48] sm:$0xff] %v842_v36 }
 0x2a2   : > { %859 = vst [vmem:[%s1432_s7 + $0x50] sm:$0xff] %v843_v37 }
 0x2a3   : > { %860 = vst [vmem:[%s1432_s7 + $0x58] sm:$0xff] %v844_v38 }
 0x2a4   : > { %861 = vst [vmem:[%s1432_s7 + $0x60] sm:$0xff] %v845_v39 }
 0x2a5   : > { %862 = vst [vmem:[%s1432_s7 + $0x68] sm:$0xff] %v846_v40 }
 0x2a6   : > { %863 = vst [vmem:[%s1432_s7 + $0x70] sm:$0xff] %v847_v41 }
 0x2a7   : > { %864 = vst [vmem:[%s1432_s7 + $0x78] sm:$0xff] %v848_v42 }
 0x2a8 PF: > { %s17_s26 = sadd.s32 1, %s1215_s26   ;;  %s1433_s24 = smov %s1211_s25 }
 0x2a9   : > { %p14_p7 = scmp.ge.s32.totalorder %s17_s26, 10   ;;  %s1434_s25 = smov %s1436_s27 }
 0x2ab   :  { %16 = sbr.rel (!%p14_p7) target bundleno = 2 (0x2), region = 104 }

</bundles_post_ra>
